<compile_context>
chip_gen: v6e
topology: v6e:2x2x1
jax: 0.10.0
libtpu: 0.0.40
codegen_flags: <defaults>
</compile_context>

<pallas_src>
import jax
import jax.numpy as jnp
from jax.experimental import pallas as pl
from jax.experimental.pallas import tpu as pltpu

WINDOW_SIZE = 11
SIGMA = 1.5
C1 = 0.01 ** 2
C2 = 0.03 ** 2

_KRON_MAX_PIXELS = 1024  # kron conv matrix stays <= 4 MiB f32 (fits v7x VMEM)


# ----------------------------------------------------------------------------
# Gaussian window helpers (host/wrapper side, plain JAX).
# ----------------------------------------------------------------------------
def _gaussian_1d(window_size: int, sigma: float) -> jnp.ndarray:
    xs = jnp.arange(window_size, dtype=jnp.float32)
    g = jnp.exp(-((xs - window_size // 2) ** 2) / (2.0 * sigma ** 2))
    return g / jnp.sum(g)


def _band_matrix(n: int, g: jnp.ndarray) -> jnp.ndarray:
    """Band matrix M with M[i, j] = g[j - i + r] for |i - j| <= r, else 0.

    (M @ x) along the leading axis == 1-D 'SAME'-zero-padded correlation with g.
    """
    r = g.shape[0] // 2
    i = jnp.arange(n)[:, None]
    j = jnp.arange(n)[None, :]
    d = j - i + r
    valid = (d >= 0) & (d < g.shape[0])
    return jnp.where(valid, g[jnp.clip(d, 0, g.shape[0] - 1)], 0.0).astype(jnp.float32)


def _vmem_budget():
    """(per-input-block byte cap, vmem_limit_bytes) derived from VMEM capacity."""
    try:
        cap = int(pltpu.get_tpu_info().vmem_capacity_bytes)
    except Exception:
        cap = 64 * 1024 * 1024  # conservative: v7x per-TensorCore VMEM
    if cap >= 128 * 1024 * 1024:          # v5e / v6e: large tiles, high limit
        return 2 * 1024 * 1024, 96 * 1024 * 1024
    return 768 * 1024, 40 * 1024 * 1024   # v7x: tighter budget


def _choose_planes_per_block(nc: int, plane_bytes: int, block_cap: int,
                             sublane_friendly: bool) -> int:
    """Largest divisor B of nc that fits the VMEM cap and keeps >= 2 blocks."""
    max_b = max(1, min(nc, block_cap // max(1, plane_bytes)))
    if nc >= 2:
        max_b = min(max_b, nc // 2)   # num_blocks >= 2: pipelining / dual-TC
    max_b = max(1, max_b)
    best = 1
    for cand in range(1, max_b + 1):
        if nc % cand != 0:
            continue
        if sublane_friendly and not (cand <= 8 or cand % 8 == 0):
            continue
        best = cand
    return best


# ----------------------------------------------------------------------------
# Small/medium-plane kernel: 2-D conv as ONE Kronecker matmul (K = N = H*W).
# ----------------------------------------------------------------------------
def _ssim_kron_kernel(x_ref, y_ref, g_ref, out_ref, z_ref):
    # x_ref, y_ref: (B, HW) f32 ; g_ref: (HW, HW) ; out_ref: (8, HW)
    # z_ref: (5*B, HW) VMEM scratch for the 5 fused conv inputs.
    B, HW = x_ref.shape
    x = x_ref[...]
    y = y_ref[...]

    # Write the 5 conv inputs directly into the scratch (no concatenate copy),
    # then ONE fused MXU matmul applies the full 2-D 'SAME' conv to all of
    # them with a >=128-wide contraction.
    z_ref[0 * B:1 * B, :] = x
    z_ref[1 * B:2 * B, :] = y
    z_ref[2 * B:3 * B, :] = x * x
    z_ref[3 * B:4 * B, :] = y * y
    z_ref[4 * B:5 * B, :] = x * y
    r = jnp.dot(z_ref[...], g_ref[...], preferred_element_type=jnp.float32)

    mu1 = r[0 * B:1 * B, :]
    mu2 = r[1 * B:2 * B, :]
    ex2 = r[2 * B:3 * B, :]
    ey2 = r[3 * B:4 * B, :]
    exy = r[4 * B:5 * B, :]

    mu1_sq = mu1 * mu1
    mu2_sq = mu2 * mu2
    mu1_mu2 = mu1 * mu2
    sigma1_sq = ex2 - mu1_sq
    sigma2_sq = ey2 - mu2_sq
    sigma12 = exy - mu1_mu2

    num = (2.0 * mu1_mu2 + C1) * (2.0 * sigma12 + C2)
    den = (mu1_sq + mu2_sq + C1) * (sigma1_sq + sigma2_sq + C2)
    ssim_map = num / den    # exact divide: den >= ~C1*C2 > 0 (per review)

    # Lane/sublane-dense partial: fold the B rows into an (8, HW) tile using
    # only elementwise VPU adds / zero-padding (no in-kernel cross-lane
    # reduction, no masked 1-lane scalar store).  Wrapper does the final sum.
    if B % 8 == 0:
        part = ssim_map.reshape(B // 8, 8, HW).sum(axis=0)
    else:  # wrapper guarantees B < 8 in this branch
        part = jnp.concatenate(
            [ssim_map, jnp.zeros((8 - B, HW), jnp.float32)], axis=0)
    out_ref[...] = part


def _ssim_sum_small(x, y, g1, H, W, block_cap, vmem_limit):
    NC = x.shape[0]
    HW = H * W
    gh = _band_matrix(H, g1)
    gw = _band_matrix(W, g1)
    # Right-multiplying row-major-flattened planes by kron(gh, gw)^T applies
    # the full 2-D 'SAME' zero-padded Gaussian conv in one matmul.
    g2t = jnp.kron(gh, gw).T.astype(jnp.float32)

    B = _choose_planes_per_block(NC, HW * 4, block_cap, sublane_friendly=True)
    num_blocks = NC // B

    xb = x.reshape(num_blocks, B, HW)
    yb = y.reshape(num_blocks, B, HW)

    # NOTE: the constant g2t index_map means it is only fetched once; a
    # pipeline_mode=pl.Buffered(1) hint could additionally drop its second
    # VMEM buffer (<= 4 MiB), left out here to keep lowering conservative.
    partials = pl.pallas_call(
        _ssim_kron_kernel,
        out_shape=jax.ShapeDtypeStruct((num_blocks, 8, HW), jnp.float32),
        grid=(num_blocks,),
        in_specs=[
            pl.BlockSpec((None, B, HW), lambda i: (i, 0, 0)),
            pl.BlockSpec((None, B, HW), lambda i: (i, 0, 0)),
            pl.BlockSpec((HW, HW), lambda i: (0, 0)),
        ],
        out_specs=pl.BlockSpec((None, 8, HW), lambda i: (i, 0, 0)),
        scratch_shapes=[pltpu.VMEM((5 * B, HW), jnp.float32)],
        compiler_params=pltpu.CompilerParams(
            dimension_semantics=("parallel",),
            vmem_limit_bytes=vmem_limit,
        ),
    )(xb, yb, g2t)
    return jnp.sum(partials)


# ----------------------------------------------------------------------------
# Large-plane fallback: separable two-pass band-matrix conv (H, W >= ~128 in
# this regime, so the contraction width is already MXU-friendly).
# ----------------------------------------------------------------------------
def _ssim_separable_kernel(x_ref, y_ref, gwt_ref, ght_ref, out_ref):
    # TODO(synk): this fallback still uses concatenate + swapaxes; if large
    # planes become a hot case, remove them via block-diagonal K-packing or a
    # separable roll+FMA formulation as per the perf review.
    B, H, W = x_ref.shape
    bh, bw = B * H, B * W
    x = x_ref[...].reshape(bh, W)
    y = y_ref[...].reshape(bh, W)

    z = jnp.concatenate([x, y, x * x, y * y, x * y], axis=0)          # (5BH, W)
    t = jnp.dot(z, gwt_ref[...], preferred_element_type=jnp.float32)  # width pass
    tt = jnp.swapaxes(t.reshape(5 * B, H, W), 1, 2).reshape(5 * bw, H)
    r = jnp.dot(tt, ght_ref[...], preferred_element_type=jnp.float32)  # height pass

    mu1 = r[0 * bw:1 * bw, :]
    mu2 = r[1 * bw:2 * bw, :]
    ex2 = r[2 * bw:3 * bw, :]
    ey2 = r[3 * bw:4 * bw, :]
    exy = r[4 * bw:5 * bw, :]

    mu1_sq = mu1 * mu1
    mu2_sq = mu2 * mu2
    mu1_mu2 = mu1 * mu2
    num = (2.0 * mu1_mu2 + C1) * (2.0 * (exy - mu1_mu2) + C2)
    den = (mu1_sq + mu2_sq + C1) * ((ex2 - mu1_sq) + (ey2 - mu2_sq) + C2)
    ssim_map = num / den

    out_ref[...] = jnp.zeros((8, 128), jnp.float32)
    out_ref[0, 0] = jnp.sum(ssim_map)


def _ssim_sum_large(x, y, g1, H, W, block_cap, vmem_limit):
    NC = x.shape[0]
    gwt = _band_matrix(W, g1).T
    ght = _band_matrix(H, g1).T
    B = _choose_planes_per_block(NC, H * W * 4, block_cap, sublane_friendly=False)
    num_blocks = NC // B

    partials = pl.pallas_call(
        _ssim_separable_kernel,
        out_shape=jax.ShapeDtypeStruct((num_blocks, 8, 128), jnp.float32),
        grid=(num_blocks,),
        in_specs=[
            pl.BlockSpec((B, H, W), lambda i: (i, 0, 0)),
            pl.BlockSpec((B, H, W), lambda i: (i, 0, 0)),
            pl.BlockSpec((W, W), lambda i: (0, 0)),
            pl.BlockSpec((H, H), lambda i: (0, 0)),
        ],
        out_specs=pl.BlockSpec((None, 8, 128), lambda i: (i, 0, 0)),
        compiler_params=pltpu.CompilerParams(
            dimension_semantics=("parallel",),
            vmem_limit_bytes=vmem_limit,
        ),
    )(x, y, gwt, ght)
    return jnp.sum(partials)


# ----------------------------------------------------------------------------
# Public wrapper: factor * (1 - SSIM(data, label)), SSIM with size_average=True.
# ----------------------------------------------------------------------------
def ssim_loss(data: jnp.ndarray, label: jnp.ndarray, factor: float) -> jnp.ndarray:
    assert data.shape == label.shape and data.ndim == 4
    N, C, H, W = data.shape
    NC, HW = N * C, H * W

    block_cap, vmem_limit = _vmem_budget()
    g1 = _gaussian_1d(WINDOW_SIZE, SIGMA)

    x = data.reshape(NC, H, W).astype(jnp.float32)
    y = label.reshape(NC, H, W).astype(jnp.float32)

    if HW <= _KRON_MAX_PIXELS:
        ssim_sum = _ssim_sum_small(x, y, g1, H, W, block_cap, vmem_limit)
    else:
        ssim_sum = _ssim_sum_large(x, y, g1, H, W, block_cap, vmem_limit)

    ssim_mean = ssim_sum / jnp.float32(NC * HW)
    return jnp.float32(factor) * (1.0 - ssim_mean)


if __name__ == "__main__":
    key = jax.random.PRNGKey(0)
    k1, k2 = jax.random.split(key)
    N, C, H, W = 2, 4, 16, 16
    data = jax.random.uniform(k1, (N, C, H, W), dtype=jnp.float32)
    label = jax.random.uniform(k2, (N, C, H, W), dtype=jnp.float32)

    factor = 1.0  # deterministic constructor argument
    loss = ssim_loss(data, label, factor)
    jax.block_until_ready(loss)

    # sanity: loss must be a finite scalar
    assert loss.shape == ()
    assert bool(jnp.isfinite(loss))
    print("KERNEL_OK")
</pallas_src>

<mosaic_0001>
module attributes {stable_mosaic.version = 11 : i64} {
  func.func @_ssim_kron_kernel(%arg0: i32, %arg1: memref<1x4x256xf32, #tpu.memory_space<vmem>>, %arg2: memref<1x4x256xf32, #tpu.memory_space<vmem>>, %arg3: memref<256x256xf32, #tpu.memory_space<vmem>>, %arg4: memref<1x8x256xf32, #tpu.memory_space<vmem>>, %arg5: memref<20x256xf32, #tpu.memory_space<vmem>>) attributes {dimension_semantics = [#tpu.dimension_semantics<parallel>], iteration_bounds = array<i64: 2>, scalar_prefetch = 0 : i64, scratch_operands = 1 : i64, tpu.core_type = #tpu.core_type<tc>, window_params = [{transform_indices = @transform_0, window_bounds = array<i64: 1, 4, 256>}, {transform_indices = @transform_1, window_bounds = array<i64: 1, 4, 256>}, {pipeline_mode = #tpu.pipeline_mode<synchronous>, transform_indices = @transform_2, window_bounds = array<i64: 256, 256>}, {transform_indices = @transform_3, window_bounds = array<i64: 1, 8, 256>}]} {
    %c0 = arith.constant 0 : index
    %c0_0 = arith.constant 0 : index
    %c0_1 = arith.constant 0 : index
    %0 = vector.load %arg1[%c0, %c0_0, %c0_1] : memref<1x4x256xf32, #tpu.memory_space<vmem>>, vector<1x4x256xf32>
    %1 = vector.shape_cast %0 : vector<1x4x256xf32> to vector<4x256xf32>
    %c0_2 = arith.constant 0 : index
    %c0_3 = arith.constant 0 : index
    %c0_4 = arith.constant 0 : index
    %2 = vector.load %arg2[%c0_2, %c0_3, %c0_4] : memref<1x4x256xf32, #tpu.memory_space<vmem>>, vector<1x4x256xf32>
    %3 = vector.shape_cast %2 : vector<1x4x256xf32> to vector<4x256xf32>
    %c0_5 = arith.constant 0 : index
    %c0_6 = arith.constant 0 : index
    %4 = vector.load %arg5[%c0_5, %c0_6] : memref<20x256xf32, #tpu.memory_space<vmem>>, vector<4x256xf32>
    tpu.vector_store %arg5[%c0_5, %c0_6], %1 {strides = array<i32>} : memref<20x256xf32, #tpu.memory_space<vmem>>, vector<4x256xf32>,
    %c4 = arith.constant 4 : index
    %c0_7 = arith.constant 0 : index
    %5 = vector.load %arg5[%c4, %c0_7] : memref<20x256xf32, #tpu.memory_space<vmem>>, vector<4x256xf32>
    tpu.vector_store %arg5[%c4, %c0_7], %3 {strides = array<i32>} : memref<20x256xf32, #tpu.memory_space<vmem>>, vector<4x256xf32>,
    %6 = arith.mulf %1, %1 : vector<4x256xf32>
    %c8 = arith.constant 8 : index
    %c0_8 = arith.constant 0 : index
    %7 = vector.load %arg5[%c8, %c0_8] : memref<20x256xf32, #tpu.memory_space<vmem>>, vector<4x256xf32>
    tpu.vector_store %arg5[%c8, %c0_8], %6 {strides = array<i32>} : memref<20x256xf32, #tpu.memory_space<vmem>>, vector<4x256xf32>,
    %8 = arith.mulf %3, %3 : vector<4x256xf32>
    %c12 = arith.constant 12 : index
    %c0_9 = arith.constant 0 : index
    %9 = vector.load %arg5[%c12, %c0_9] : memref<20x256xf32, #tpu.memory_space<vmem>>, vector<4x256xf32>
    tpu.vector_store %arg5[%c12, %c0_9], %8 {strides = array<i32>} : memref<20x256xf32, #tpu.memory_space<vmem>>, vector<4x256xf32>,
    %10 = arith.mulf %1, %3 : vector<4x256xf32>
    %c16 = arith.constant 16 : index
    %c0_10 = arith.constant 0 : index
    %11 = vector.load %arg5[%c16, %c0_10] : memref<20x256xf32, #tpu.memory_space<vmem>>, vector<4x256xf32>
    tpu.vector_store %arg5[%c16, %c0_10], %10 {strides = array<i32>} : memref<20x256xf32, #tpu.memory_space<vmem>>, vector<4x256xf32>,
    %c0_11 = arith.constant 0 : index
    %c0_12 = arith.constant 0 : index
    %12 = vector.load %arg5[%c0_11, %c0_12] : memref<20x256xf32, #tpu.memory_space<vmem>>, vector<20x256xf32>
    %c0_13 = arith.constant 0 : index
    %c0_14 = arith.constant 0 : index
    %13 = vector.load %arg3[%c0_13, %c0_14] : memref<256x256xf32, #tpu.memory_space<vmem>>, vector<256x256xf32>
    %cst = arith.constant dense<0.000000e+00> : vector<20x256xf32>
    %14 = tpu.matmul %12, %13, %cst {dimension_numbers = #tpu.dot_dimension_numbers<[1], [0], [0], [1], [0, 0, 1, 1], [], []>} : vector<20x256xf32>, vector<256x256xf32>, vector<20x256xf32> -> vector<20x256xf32>
    %15 = vector.extract_strided_slice %14 {offsets = [0, 0], sizes = [4, 256], strides = [1, 1]} : vector<20x256xf32> to vector<4x256xf32>
    %16 = vector.extract_strided_slice %14 {offsets = [4, 0], sizes = [4, 256], strides = [1, 1]} : vector<20x256xf32> to vector<4x256xf32>
    %17 = vector.extract_strided_slice %14 {offsets = [8, 0], sizes = [4, 256], strides = [1, 1]} : vector<20x256xf32> to vector<4x256xf32>
    %18 = vector.extract_strided_slice %14 {offsets = [12, 0], sizes = [4, 256], strides = [1, 1]} : vector<20x256xf32> to vector<4x256xf32>
    %19 = vector.extract_strided_slice %14 {offsets = [16, 0], sizes = [4, 256], strides = [1, 1]} : vector<20x256xf32> to vector<4x256xf32>
    %20 = arith.mulf %15, %15 : vector<4x256xf32>
    %21 = arith.mulf %16, %16 : vector<4x256xf32>
    %22 = arith.mulf %15, %16 : vector<4x256xf32>
    %23 = arith.subf %17, %20 : vector<4x256xf32>
    %24 = arith.subf %18, %21 : vector<4x256xf32>
    %25 = arith.subf %19, %22 : vector<4x256xf32>
    %cst_15 = arith.constant 2.000000e+00 : f32
    %26 = vector.broadcast %cst_15 : f32 to vector<4x256xf32>
    %27 = arith.mulf %26, %22 : vector<4x256xf32>
    %cst_16 = arith.constant 9.99999974E-5 : f32
    %28 = vector.broadcast %cst_16 : f32 to vector<4x256xf32>
    %29 = arith.addf %27, %28 : vector<4x256xf32>
    %cst_17 = arith.constant 2.000000e+00 : f32
    %30 = vector.broadcast %cst_17 : f32 to vector<4x256xf32>
    %31 = arith.mulf %30, %25 : vector<4x256xf32>
    %cst_18 = arith.constant 8.99999984E-4 : f32
    %32 = vector.broadcast %cst_18 : f32 to vector<4x256xf32>
    %33 = arith.addf %31, %32 : vector<4x256xf32>
    %34 = arith.mulf %29, %33 : vector<4x256xf32>
    %35 = arith.addf %20, %21 : vector<4x256xf32>
    %cst_19 = arith.constant 9.99999974E-5 : f32
    %36 = vector.broadcast %cst_19 : f32 to vector<4x256xf32>
    %37 = arith.addf %35, %36 : vector<4x256xf32>
    %38 = arith.addf %23, %24 : vector<4x256xf32>
    %cst_20 = arith.constant 8.99999984E-4 : f32
    %39 = vector.broadcast %cst_20 : f32 to vector<4x256xf32>
    %40 = arith.addf %38, %39 : vector<4x256xf32>
    %41 = arith.mulf %37, %40 : vector<4x256xf32>
    %42 = arith.divf %34, %41 : vector<4x256xf32>
    %cst_21 = arith.constant 0.000000e+00 : f32
    %43 = vector.broadcast %cst_21 : f32 to vector<4x256xf32>
    %44 = tpu.concatenate %42, %43 in 0 : vector<4x256xf32>, vector<4x256xf32> -> vector<8x256xf32>
    %c0_22 = arith.constant 0 : index
    %c0_23 = arith.constant 0 : index
    %c0_24 = arith.constant 0 : index
    %45 = vector.load %arg4[%c0_22, %c0_23, %c0_24] : memref<1x8x256xf32, #tpu.memory_space<vmem>>, vector<1x8x256xf32>
    %46 = vector.shape_cast %45 : vector<1x8x256xf32> to vector<8x256xf32>
    %47 = vector.shape_cast %44 : vector<8x256xf32> to vector<1x8x256xf32>
    tpu.vector_store %arg4[%c0_22, %c0_23, %c0_24], %47 {strides = array<i32>} : memref<1x8x256xf32, #tpu.memory_space<vmem>>, vector<1x8x256xf32>,
    return
  }
  func.func @transform_0(%arg0: i32) -> (i32, i32, i32) {
    %c0_i32 = arith.constant 0 : i32
    %c0_i32_0 = arith.constant 0 : i32
    %c0_i32_1 = arith.constant 0 : i32
    return %arg0, %c0_i32, %c0_i32_0 : i32, i32, i32
  }
  func.func @transform_1(%arg0: i32) -> (i32, i32, i32) {
    %c0_i32 = arith.constant 0 : i32
    %c0_i32_0 = arith.constant 0 : i32
    %c0_i32_1 = arith.constant 0 : i32
    return %arg0, %c0_i32, %c0_i32_0 : i32, i32, i32
  }
  func.func @transform_2(%arg0: i32) -> (i32, i32) {
    %c0_i32 = arith.constant 0 : i32
    %c0_i32_0 = arith.constant 0 : i32
    %c0_i32_1 = arith.constant 0 : i32
    return %c0_i32, %c0_i32_0 : i32, i32
  }
  func.func @transform_3(%arg0: i32) -> (i32, i32, i32) {
    %c0_i32 = arith.constant 0 : i32
    %c0_i32_0 = arith.constant 0 : i32
    %c0_i32_1 = arith.constant 0 : i32
    return %arg0, %c0_i32, %c0_i32_0 : i32, i32, i32
  }
}

</mosaic_0001>

<bundles_post_ra>
// kernel: tpu_custom_call.1
= control target key start
LH: loop header
LB: loop body
LE: loop exit
PB: predicated region body
PF: predicated region fallthrough
CT: control target
= control target key end

     0   :  { %8 = vsyncpa [#allocation4], 0  ;;  %s1139_s0 = inlined_call_operand.hbm [shape: f32[2,4,256], index: 0, kind: input, shape index: {}]   ;;  %s1140_s1 = inlined_call_operand.hbm [shape: f32[2,4,256], index: 1, kind: input, shape index: {}]   ;;  %s1141_s2 = inlined_call_operand.hbm [shape: f32[256,256], index: 2, kind: input, shape index: {}]   ;;  %s1142_s3 = inlined_call_operand.hbm [shape: f32[2,8,256], index: 3, kind: output, shape index: {}]  }
   0x1   :  { %10 = vsyncpa [#allocation4 + $0x1], 0 }
   0x2   :  { %11 = vsyncpa [#allocation7], 0 }
   0x3   :  { %13 = vsyncpa [#allocation7 + $0x1], 0 }
   0x4   :  { %14 = vsyncpa [#allocation5], 0 }
   0x5   :  { %16 = vsyncpa [#allocation5 + $0x1], 0  ;;  %s933_s12 = smov 0   ;;  %s935_s13 = smov 0  }
   0x6   :  { %s937_s14 = smov 0   ;;  %s939_s15 = smov 0  }
   0x7 LB: > { %s954_s16 = sadd.s32 4294967295, %s905_s15   ;;  %s594_s17 = sadd.s32 4294967294, %s905_s15   ;;  %s905_s15 = sphi %s939_s15, %s1164_s15   ;;  %s901_s14 = sphi %s937_s14, %s1163_s14   ;;  %s897_s13 = sphi %s935_s13, %s1162_s13   ;;  %s893_s12 = sphi %s933_s12, %s1161_s12  }
   0x8   : > { %p42_p0 = scmp.ne.s32.totalorder %s897_s13, %s893_s12  ;;  %p1143_p1 = scmp.eq.s32.totalorder %s954_s16, 0 }
   0x9   : > { %p119_p3 = scmp.eq.s32.totalorder %s594_s17, 1  ;;  %p595_p5 = scmp.ge.s32.totalorder %s905_s15, 1 }
   0xa   : > { %p963_p4 = por %p1143_p1, %p42_p0  ;;  %p126_p7 = scmp.lt.s32.totalorder %s905_s15, 3 }
   0xb   : > { %p968_p6 = por %p119_p3, %p42_p0  ;;  %s907_s21 = smov [#allocation8]  }
   0xc   : > { %s1147_s18 = scalar_select %p963_p4, 1, 0 }
   0xd   : > { %s1148_s19 = scalar_select %p968_p6, 1, 0 }
   0xe   : > { %p973_p8 = pnand %p595_p5, %p126_p7  ;;  %s138_s22 = sshll.u32 %s907_s21, 4  ;;  %s139_s22 = int_to_ptr.vmem [resolvable:$true] %s138_s22 }
   0xf   : > { %s987_s24 = sadd.s32 1, %s905_s15   ;;  %s29_s25 = sadd.s32 1, %s901_s14 }
  0x10   : > { %s1149_s20 = scalar_select %p973_p8, 1, 0 }
  0x11   : > { %p691_p9 = pneg %p973_p8  ;;  %s26_s26 = ssub.s32 %s905_s15, %s987_s24 }
  0x12   : > { %s762_s27 = scalar_lea.vmem %s139_s22, 8192  ;;  %p770_p5 = scmp.lt.s32.totalorder %s139_s22, %s139_s22 }
  0x13   : > { %p982_p11 = pnand %p691_p9, %p1143_p1  ;;  %p763_p13 = scmp.ne.s32.totalorder %s139_s22, %s762_s27 }
  0x14   : > { %p771_p7 = scmp.lt.s32.totalorder %s762_s27, %s762_s27 }
  0x15   : > { %p753_p12 = pneg %p982_p11 }
  0x16   : > { %p772_p10 = por %p771_p7, %p770_p5 }
  0x17   : > { %p765_p0 = pnand %p763_p13, %p753_p12 }
  0x19   : > { %p766_p3 = pneg %p765_p0 }
  0x1b   : > { %p773_p2 = pnand %p772_p10, %p766_p3 }
  0x1d   : > { %776 = shalt.err (!%p773_p2)
}
  0x1e   : > { %s908_s28 = smov 256   ;;  %s909_s29 = smov 16  }
  0x1f   : > { %694 = dma.hbm_to_vmem [thread:$0]  (!%p982_p11), %s1141_s2, 8192, %s139_s22, [#allocation7], %s908_s28, %s908_s28, %s909_s29  }
  0x20   : > { %p27_p9 = scmp.eq.s32.totalorder %s26_s26, 0  ;;  %p36_p12 = scmp.ne.s32.totalorder %s901_s14, %s897_s13 }
  0x21   : > { %p37_p10 = scmp.eq.s32.totalorder %s905_s15, 0  ;;  %p707_p2 = scmp.lt.s32.totalorder %s905_s15, 2 }
  0x22   : > { %s1004_s5 = scalar_select %p27_p9, %s901_s14, %s29_s25  }
  0x23   : > { %p38_p13 = por %p37_p10, %p36_p12  ;;  %p1151_p0 = scmp.eq.s32.totalorder %s954_s16, 1 }
  0x24   : > { %s152_s7 = sand.u32 1, %s901_s14   ;;  %s614_s8 = sshll.u32 %s905_s15, 7 }
  0x25   : > { %p1008_p3 = por %p1151_p0, %p36_p12  ;;  %s1014_s9 = sshll.u32 %s152_s7, 3 }
  0x26   : > { %s1019_s17 = scalar_lea.hbm %s1139_s0, %s614_s8  ;;  %s156_s21 = scalar_lea.vmem [#allocation3], %s1014_s9 }
  0x27   : > { %s1152_s6 = scalar_select %p1008_p3, 1, 0 }
  0x28   : > { %s164_s22 = sshll.u32 %s156_s21, 4  ;;  %p1022_p11 = pnand %p707_p2, %p38_p13  ;;  %s165_s22 = int_to_ptr.vmem [resolvable:$true] %s164_s22 }
  0x29   : > { %s1029_s27 = scalar_lea.hbm %s1140_s1, %s614_s8  ;;  %s153_s28 = scalar_lea.sflag [#allocation4], %s152_s7 }
  0x2a   : > { %s777_s29 = scalar_lea.hbm %s1019_s17, 128  ;;  %p779_p7 = pneg %p1022_p11 }
  0x2b   : > { %p778_p5 = scmp.ne.s32.totalorder %s1019_s17, %s777_s29  ;;  %s782_s10 = scalar_lea.hbm %s1139_s0, 256 }
  0x2c   : > { %p783_p10 = scmp.lt.s32.totalorder %s1019_s17, %s1139_s0  ;;  %p784_p2 = scmp.lt.s32.totalorder %s782_s10, %s777_s29 }
  0x2d   : > { %p780_p9 = pnand %p779_p7, %p778_p5 }
  0x2e   : > { %p785_p13 = por %p784_p2, %p783_p10 }
  0x2f   : > { %p781_p12 = pneg %p780_p9 }
  0x31   : > { %p786_p0 = pnand %p785_p13, %p781_p12 }
  0x33   : > { %789 = shalt.err (!%p786_p0)
}
  0x34   : > { %s790_s7 = scalar_lea.vmem %s165_s22, 128  ;;  %s910_s8 = smov [#allocation3]  }
  0x35   : > { %p791_p1 = scmp.ne.s32.totalorder %s165_s22, %s790_s7  ;;  %s795_s25 = sshll.u32 %s910_s8, 4  ;;  %s796_s25 = int_to_ptr.vmem [resolvable:$false] %s795_s25 }
  0x36   : > { %s797_s26 = scalar_lea.vmem %s796_s25, 256  ;;  %p798_p9 = scmp.lt.s32.totalorder %s165_s22, %s796_s25 }
  0x37   : > { %p793_p6 = pnand %p791_p1, %p779_p7  ;;  %p799_p3 = scmp.lt.s32.totalorder %s797_s26, %s790_s7 }
  0x39   : > { %p794_p5 = pneg %p793_p6  ;;  %p800_p4 = por %p799_p3, %p798_p9 }
  0x3b   : > { %p801_p8 = pnand %p800_p4, %p794_p5 }
  0x3d   : > { %804 = shalt.err (!%p801_p8)
}
  0x3e   : > { %698 = dma.hbm_to_vmem [thread:$0]  (!%p1022_p11), %s1019_s17, 128, %s165_s22, %s153_s28  }
  0x3f   : > { %s171_s29 = sand.u32 1, %s905_s15   ;;  %s175_s30 = scalar_lea.vmem [#allocation6], %s1014_s9 }
  0x40   : > { %s183_s4 = sshll.u32 %s175_s30, 4  ;;  %s172_s10 = scalar_lea.sflag [#allocation7], %s171_s29  ;;  %s184_s4 = int_to_ptr.vmem [resolvable:$true] %s183_s4 }
  0x41   : > { %s805_s11 = scalar_lea.hbm %s1029_s27, 128  ;;  %s810_s8 = scalar_lea.hbm %s1140_s1, 256 }
  0x42   : > { %p806_p1 = scmp.ne.s32.totalorder %s1029_s27, %s805_s11  ;;  %p811_p8 = scmp.lt.s32.totalorder %s1029_s27, %s1140_s1 }
  0x43   : > { %p812_p3 = scmp.lt.s32.totalorder %s810_s8, %s805_s11 }
  0x44   : > { %p808_p4 = pnand %p806_p1, %p779_p7 }
  0x45   : > { %p813_p12 = por %p812_p3, %p811_p8 }
  0x46   : > { %p809_p6 = pneg %p808_p4 }
  0x48   : > { %p814_p10 = pnand %p813_p12, %p809_p6 }
  0x4a   : > { %817 = shalt.err (!%p814_p10)
}
  0x4b   : > { %s818_s9 = scalar_lea.vmem %s184_s4, 128  ;;  %s911_s17 = smov [#allocation6]  }
  0x4c   : > { %p819_p2 = scmp.ne.s32.totalorder %s184_s4, %s818_s9  ;;  %s823_s22 = sshll.u32 %s911_s17, 4  ;;  %s824_s22 = int_to_ptr.vmem [resolvable:$false] %s823_s22 }
  0x4d   : > { %s825_s28 = scalar_lea.vmem %s824_s22, 256  ;;  %p826_p5 = scmp.lt.s32.totalorder %s184_s4, %s824_s22 }
  0x4e   : > { %p821_p13 = pnand %p819_p2, %p779_p7  ;;  %p827_p9 = scmp.lt.s32.totalorder %s825_s28, %s818_s9 }
  0x50   : > { %p822_p0 = pneg %p821_p13  ;;  %p828_p1 = por %p827_p9, %p826_p5 }
  0x52   : > { %p829_p4 = pnand %p828_p1, %p822_p0 }
  0x54   : > { %832 = shalt.err (!%p829_p4)
}
  0x55   : > { %701 = dma.hbm_to_vmem [thread:$0]  (!%p1022_p11), %s1029_s27, 128, %s184_s4, %s172_s10  }
  0x56   : > { %p1154_p6 = scmp.ne.s32.totalorder %s1149_s20, 0 }
  0x57   : > { %s1074_s29 = sand.u32 (!%p1154_p6), 1, %s897_s13   ;;  %p1155_p7 = scmp.ne.s32.totalorder (!%p1154_p6), %s1147_s18, 0 }
  0x58   : > { %192 = sbr.rel (%p1154_p6) target bundleno = 403 (0x193), region = 32  ;;  %s605_s30 = sshll.u32 (!%p1154_p6), %s1074_s29, 3 }
  0x59   : > { %s195_s11 = scalar_lea.sflag (!%p1154_p6), [#allocation4], %s1074_s29  ;;  %s1078_s21 = scalar_lea.vmem (!%p1154_p6), [#allocation3], %s605_s30 }
  0x5d   : > { %876 = dma.done.wait (%p1155_p7), %s195_s11, 128  }
  0x5e   : > { %878 = vsyncadd (%p1155_p7), %s195_s11, 4294967168  ;;  %s203_s23 = sand.u32 1, %s954_s16   ;;  %s1085_s27 = scalar_lea.vmem [#allocation6], %s605_s30 }
  0x5f   : > { %s204_s20 = scalar_lea.sflag [#allocation7], %s203_s23 }
  0x60   : > { %880 = dma.done.wait (%p1155_p7), %s204_s20, 128  }
  0x61   : > { %882 = vsyncadd (%p1155_p7), %s204_s20, 4294967168  ;;  %p1156_p11 = scmp.eq.s32.totalorder %s954_s16, 0 }
  0x63   : > { %884 = dma.done.wait (%p1156_p11), [#allocation7], 8192   ;;  %p1157_p8 = pmov %p1156_p11 }
  0x64   : > { %v306_v0 = vld [vmem:[#allocation8 + $0xf8] sm:$0xff]  ;;  %v305_v1 = vld [vmem:[#allocation8 + $0xf0] sm:$0xff]  ;;  %v304_v2 = vld [vmem:[#allocation8 + $0xe8] sm:$0xff]  ;;  %s608_s18 = sshll.u32 %s1074_s29, 4  ;;  %vm472_vm0 = vcmask 1043456   ;;  %s616_s4 = sshll.u32 %s954_s16, 8 }
  0x65   : > { %886 = vsyncadd (%p1157_p8), [#allocation7], 4294959104  ;;  %339 = vmatprep.subr.mxu0 %v306_v0  ;;  %617 = vmatprep.subr.mxu1 %v306_v0  ;;  %v303_v3 = vld [vmem:[#allocation8 + $0xe0] sm:$0xff]  ;;  %v302_v4 = vld [vmem:[#allocation8 + $0xd8] sm:$0xff]  ;;  %s238_s10 = scalar_lea.vmem [#allocation9], %s608_s18  ;;  %s1102_s26 = scalar_lea.hbm %s1142_s3, %s616_s4 }
  0x66   : > { %340 = vmatpush1.msra.mxu0 %v305_v1  ;;  %649 = vmatpush1.msra.mxu1 %v305_v1  ;;  %v301_v5 = vld [vmem:[#allocation8 + $0xd0] sm:$0xff]  ;;  %v300_v6 = vld [vmem:[#allocation8 + $0xc8] sm:$0xff]  ;;  %v299_v7 = vld [vmem:[#allocation8 + $0xc0] sm:$0xff]  ;;  %s492_s7 = sshll.u32 %s238_s10, 4  ;;  %s478_s9 = scalar_lea.sflag [#allocation5], %s1074_s29  ;;  %s493_s7 = int_to_ptr.vmem [resolvable:$true] %s492_s7 }
  0x67   : > { %341 = vmatprep.subr.mxu0 %v304_v2  ;;  %618 = vmatprep.subr.mxu1 %v304_v2  ;;  %v298_v8 = vld [vmem:[#allocation8 + $0xb8] sm:$0xff]  ;;  %v297_v9 = vld [vmem:[#allocation8 + $0xb0] sm:$0xff]  ;;  %v296_v10 = vld [vmem:[#allocation8 + $0xa8] sm:$0xff]  ;;  %s833_s17 = scalar_lea.vmem %s493_s7, 256  ;;  %p1158_p12 = scmp.ne.s32.totalorder %s1152_s6, 0 }
  0x68   : > { %342 = vmatpush1.msra.mxu0 %v303_v3  ;;  %650 = vmatpush1.msra.mxu1 %v303_v3  ;;  %v295_v11 = vld [vmem:[#allocation8 + $0xa0] sm:$0xff]  ;;  %v294_v12 = vld [vmem:[#allocation8 + $0x98] sm:$0xff]  ;;  %v293_v13 = vld [vmem:[#allocation8 + $0x90] sm:$0xff]  ;;  %p834_p3 = scmp.ne.s32.totalorder %s493_s7, %s833_s17  ;;  %s912_s16 = smov [#allocation9]  }
  0x69   : > { %343 = vmatprep.subr.mxu0 %v302_v4  ;;  %619 = vmatprep.subr.mxu1 %v302_v4  ;;  %v292_v14 = vld [vmem:[#allocation8 + $0x88] sm:$0xff]  ;;  %v291_v15 = vld [vmem:[#allocation8 + $0x80] sm:$0xff]  ;;  %v290_v16 = vld [vmem:[#allocation8 + $0x78] sm:$0xff]  ;;  %s837_s22 = sshll.u32 %s912_s16, 4  ;;  %s838_s22 = int_to_ptr.vmem [resolvable:$false] %s837_s22 }
  0x6a   : > { %344 = vmatpush1.msra.mxu0 %v301_v5  ;;  %651 = vmatpush1.msra.mxu1 %v301_v5  ;;  %v289_v17 = vld [vmem:[#allocation8 + $0x70] sm:$0xff]  ;;  %v288_v18 = vld [vmem:[#allocation8 + $0x68] sm:$0xff]  ;;  %v287_v19 = vld [vmem:[#allocation8 + $0x60] sm:$0xff]  ;;  %p835_p10 = pnand %p834_p3, %p1158_p12  ;;  %s839_s28 = scalar_lea.vmem %s838_s22, 512 }
  0x6b   : > { %345 = vmatprep.subr.mxu0 %v300_v6  ;;  %620 = vmatprep.subr.mxu1 %v300_v6  ;;  %v286_v20 = vld [vmem:[#allocation8 + $0x58] sm:$0xff]  ;;  %v285_v21 = vld [vmem:[#allocation8 + $0x50] sm:$0xff]  ;;  %v284_v22 = vld [vmem:[#allocation8 + $0x48] sm:$0xff]  ;;  %p840_p13 = scmp.lt.s32.totalorder %s493_s7, %s838_s22  ;;  %p841_p0 = scmp.lt.s32.totalorder %s839_s28, %s833_s17 }
  0x6c   : > { %346 = vmatpush1.msra.mxu0 %v299_v7  ;;  %652 = vmatpush1.msra.mxu1 %v299_v7  ;;  %v283_v23 = vld [vmem:[#allocation8 + $0x40] sm:$0xff]  ;;  %v240_v25 = vld [vmem:[%s1085_s27] sm:$0xff]  ;;  %v280_v33 = vld [vmem:[#allocation8 + $0x28] sm:$0xff]  ;;  %p836_p2 = pneg %p835_p10 }
  0x6d   : > { %347 = vmatprep.subr.mxu0 %v298_v8  ;;  %621 = vmatprep.subr.mxu1 %v298_v8  ;;  %v239_v24 = vld [vmem:[%s1078_s21] sm:$0xff]  ;;  %v282_v26 = vld [vmem:[#allocation8 + $0x38] sm:$0xff]  ;;  %250 = vst [vmem:[#allocation2 + $0x10] sm:$0xf0] %v240_v25  ;;  %v257_v29 = vmul.f32 %v240_v25, %v240_v25  ;;  %v281_v30 = vld [vmem:[#allocation8 + $0x30] sm:$0xff]  ;;  %v247_v31 = vcombine.low %v240_v25, %v240_v25  ;;  %p842_p5 = por %p841_p0, %p840_p13 }
  0x6e   : > { %348 = vmatpush1.msra.mxu0 %v297_v9  ;;  %653 = vmatpush1.msra.mxu1 %v297_v9  ;;  %v242_v27 = vcombine.high %v239_v24, %v239_v24  ;;  %244 = vst [vmem:[#allocation2 + $0x28] sm:$0xf] %v239_v24  ;;  %v251_v28 = vmul.f32 %v239_v24, %v239_v24  ;;  %v279_v36 = vld [vmem:[#allocation8 + $0x20] sm:$0xff]  ;;  %v278_v38 = vld [vmem:[#allocation8 + $0x18] sm:$0xff]  ;;  %v277_v39 = vld [vmem:[#allocation8 + $0x10] sm:$0xff] }
  0x6f   : > { %349 = vmatprep.subr.mxu0 %v296_v10  ;;  %622 = vmatprep.subr.mxu1 %v296_v10  ;;  %v263_v32 = vmul.f32 %v240_v25, %v239_v24  ;;  %262 = vst [vmem:[#allocation2] sm:$0xf0] %v257_v29  ;;  %v259_v35 = vcombine.low %v257_v29, %v257_v29  ;;  %249 = vst [vmem:[#allocation2 + $0x28] sm:$0xf0] %v247_v31  ;;  %v276_v40 = vld [vmem:[#allocation8 + $0x8] sm:$0xff]  ;;  %v275_v41 = vld [vmem:[#allocation8] sm:$0xff]  ;;  %p843_p9 = pnand %p842_p5, %p836_p2 }
  0x70   : > { %350 = vmatpush1.msra.mxu0 %v295_v11  ;;  %654 = vmatpush1.msra.mxu1 %v295_v11  ;;  %245 = vst [vmem:[#allocation2 + $0x10] sm:$0xf] %v242_v27  ;;  %v253_v34 = vcombine.high %v251_v28, %v251_v28  ;;  %255 = vst [vmem:[#allocation2 + $0x8] sm:$0xf] %v251_v28  ;;  %v338_v42 = vld [vmem:[#allocation8 + $0x1f8] sm:$0xff]  ;;  %v337_v43 = vld [vmem:[#allocation8 + $0x1f0] sm:$0xff] }
  0x71   : > { %351 = vmatprep.subr.mxu0 %v294_v12  ;;  %623 = vmatprep.subr.mxu1 %v294_v12  ;;  %v265_v37 = vcombine.high %v263_v32, %v263_v32  ;;  %267 = vst [vmem:[#allocation2 + $0x18] sm:$0xf] %v263_v32  ;;  %261 = vst [vmem:[#allocation2 + $0x8] sm:$0xf0] %v259_v35  ;;  %v336_v44 = vld [vmem:[#allocation8 + $0x1e8] sm:$0xff]  ;;  %v335_v45 = vld [vmem:[#allocation8 + $0x1e0] sm:$0xff] }
  0x72   : > { %352 = vmatpush1.msra.mxu0 %v293_v13  ;;  %655 = vmatpush1.msra.mxu1 %v293_v13  ;;  %256 = vst [vmem:[#allocation2] sm:$0xf] %v253_v34  ;;  %v334_v46 = vld [vmem:[#allocation8 + $0x1d8] sm:$0xff]  ;;  %v333_v47 = vld [vmem:[#allocation8 + $0x1d0] sm:$0xff]  ;;  %v332_v48 = vld [vmem:[#allocation8 + $0x1c8] sm:$0xff] }
  0x73   : > { %353 = vmatprep.subr.mxu0 %v292_v14  ;;  %624 = vmatprep.subr.mxu1 %v292_v14  ;;  %268 = vst [vmem:[#allocation2 + $0x20] sm:$0xf] %v265_v37  ;;  %v331_v49 = vld [vmem:[#allocation8 + $0x1c0] sm:$0xff]  ;;  %v330_v50 = vld [vmem:[#allocation8 + $0x1b8] sm:$0xff]  ;;  %v329_v51 = vld [vmem:[#allocation8 + $0x1b0] sm:$0xff] }
  0x74   : > { %354 = vmatpush1.msra.mxu0 %v291_v15  ;;  %656 = vmatpush1.msra.mxu1 %v291_v15  ;;  %v328_v52 = vld [vmem:[#allocation8 + $0x1a8] sm:$0xff]  ;;  %v327_v53 = vld [vmem:[#allocation8 + $0x1a0] sm:$0xff]  ;;  %v326_v54 = vld [vmem:[#allocation8 + $0x198] sm:$0xff] }
  0x75   : > { %355 = vmatprep.subr.mxu0 %v290_v16  ;;  %625 = vmatprep.subr.mxu1 %v290_v16  ;;  %v325_v55 = vld [vmem:[#allocation8 + $0x190] sm:$0xff]  ;;  %v324_v56 = vld [vmem:[#allocation8 + $0x188] sm:$0xff]  ;;  %v323_v57 = vld [vmem:[#allocation8 + $0x180] sm:$0xff] }
  0x76   : > { %356 = vmatpush1.msra.mxu0 %v289_v17  ;;  %657 = vmatpush1.msra.mxu1 %v289_v17  ;;  %v322_v58 = vld [vmem:[#allocation8 + $0x178] sm:$0xff]  ;;  %v321_v59 = vld [vmem:[#allocation8 + $0x170] sm:$0xff]  ;;  %v320_v60 = vld [vmem:[#allocation8 + $0x168] sm:$0xff] }
  0x77   : > { %357 = vmatprep.subr.mxu0 %v288_v18  ;;  %626 = vmatprep.subr.mxu1 %v288_v18  ;;  %v319_v61 = vld [vmem:[#allocation8 + $0x160] sm:$0xff]  ;;  %v318_v62 = vld [vmem:[#allocation8 + $0x158] sm:$0xff]  ;;  %v317_v63 = vld [vmem:[#allocation8 + $0x150] sm:$0xff] }
  0x78   : > { %358 = vmatpush1.msra.mxu0 %v287_v19  ;;  %658 = vmatpush1.msra.mxu1 %v287_v19  ;;  %v316_v0 = vld [vmem:[#allocation8 + $0x148] sm:$0xff]  ;;  %v315_v1 = vld [vmem:[#allocation8 + $0x140] sm:$0xff]  ;;  %v314_v2 = vld [vmem:[#allocation8 + $0x138] sm:$0xff] }
  0x79   : > { %359 = vmatprep.subr.mxu0 %v286_v20  ;;  %627 = vmatprep.subr.mxu1 %v286_v20  ;;  %v313_v3 = vld [vmem:[#allocation8 + $0x130] sm:$0xff]  ;;  %v312_v4 = vld [vmem:[#allocation8 + $0x128] sm:$0xff]  ;;  %v311_v5 = vld [vmem:[#allocation8 + $0x120] sm:$0xff] }
  0x7a   : > { %360 = vmatpush1.msra.mxu0 %v285_v21  ;;  %659 = vmatpush1.msra.mxu1 %v285_v21  ;;  %v310_v6 = vld [vmem:[#allocation8 + $0x118] sm:$0xff]  ;;  %v309_v7 = vld [vmem:[#allocation8 + $0x110] sm:$0xff]  ;;  %v308_v8 = vld [vmem:[#allocation8 + $0x108] sm:$0xff] }
  0x7b   : > { %361 = vmatprep.subr.mxu0 %v284_v22  ;;  %628 = vmatprep.subr.mxu1 %v284_v22  ;;  %v307_v9 = vld [vmem:[#allocation8 + $0x100] sm:$0xff]  ;;  %v272_v11 = vld [vmem:[#allocation2] sm:$0xff]  ;;  %v269_v12 = vld [vmem:[#allocation2 + $0x28] sm:$0xff] }
  0x7c   : > { %362 = vmatpush1.msra.mxu0 %v283_v23  ;;  %660 = vmatpush1.msra.mxu1 %v283_v23  ;;  %v270_v10 = vld [vmem:[#allocation2 + $0x10] sm:$0xff]  ;;  %v271_v13 = vld [vmem:[#allocation2 + $0x8] sm:$0xff]  ;;  %v274_v14 = vld [vmem:[#allocation2 + $0x20] sm:$0xf] }
  0x7d   : > { %363 = vmatprep.subr.mxu0 %v282_v26  ;;  %629 = vmatprep.subr.mxu1 %v282_v26  ;;  %v273_v15 = vld [vmem:[#allocation2 + $0x18] sm:$0xf] }
  0x7e   : > { %364 = vmatpush1.msra.mxu0 %v281_v30  ;;  %661 = vmatpush1.msra.mxu1 %v281_v30 }
  0x7f   : > { %365 = vmatprep.subr.mxu0 %v280_v33  ;;  %630 = vmatprep.subr.mxu1 %v280_v33 }
  0x80   : > { %366 = vmatpush1.msra.mxu0 %v279_v36  ;;  %662 = vmatpush1.msra.mxu1 %v279_v36 }
  0x81   : > { %367 = vmatprep.subr.mxu0 %v278_v38  ;;  %631 = vmatprep.subr.mxu1 %v278_v38 }
  0x82   : > { %368 = vmatpush1.msra.mxu0 %v277_v39  ;;  %663 = vmatpush1.msra.mxu1 %v277_v39 }
  0x83   : > { %369 = vmatprep.subr.mxu0 %v276_v40  ;;  %632 = vmatprep.subr.mxu1 %v276_v40 }
  0x84   : > { %370 = vmatpush1.msra.mxu0 %v275_v41  ;;  %664 = vmatpush1.msra.mxu1 %v275_v41 }
  0x85   : > { %371 = vmatprep.subr.mxu0 %v338_v42  ;;  %633 = vmatprep.subr.mxu1 %v338_v42 }
  0x86   : > { %372 = vmatpush2.msra.mxu0 %v337_v43  ;;  %665 = vmatpush2.msra.mxu1 %v337_v43 }
  0x87   : > { %373 = vmatprep.subr.mxu0 %v336_v44  ;;  %634 = vmatprep.subr.mxu1 %v336_v44 }
  0x88   : > { %374 = vmatpush2.msra.mxu0 %v335_v45  ;;  %666 = vmatpush2.msra.mxu1 %v335_v45 }
  0x89   : > { %375 = vmatprep.subr.mxu0 %v334_v46  ;;  %635 = vmatprep.subr.mxu1 %v334_v46 }
  0x8a   : > { %376 = vmatpush2.msra.mxu0 %v333_v47  ;;  %667 = vmatpush2.msra.mxu1 %v333_v47 }
  0x8b   : > { %377 = vmatprep.subr.mxu0 %v332_v48  ;;  %636 = vmatprep.subr.mxu1 %v332_v48 }
  0x8c   : > { %378 = vmatpush2.msra.mxu0 %v331_v49  ;;  %668 = vmatpush2.msra.mxu1 %v331_v49 }
  0x8d   : > { %379 = vmatprep.subr.mxu0 %v330_v50  ;;  %637 = vmatprep.subr.mxu1 %v330_v50 }
  0x8e   : > { %380 = vmatpush2.msra.mxu0 %v329_v51  ;;  %669 = vmatpush2.msra.mxu1 %v329_v51 }
  0x8f   : > { %381 = vmatprep.subr.mxu0 %v328_v52  ;;  %638 = vmatprep.subr.mxu1 %v328_v52 }
  0x90   : > { %382 = vmatpush2.msra.mxu0 %v327_v53  ;;  %670 = vmatpush2.msra.mxu1 %v327_v53 }
  0x91   : > { %383 = vmatprep.subr.mxu0 %v326_v54  ;;  %639 = vmatprep.subr.mxu1 %v326_v54 }
  0x92   : > { %384 = vmatpush2.msra.mxu0 %v325_v55  ;;  %671 = vmatpush2.msra.mxu1 %v325_v55 }
  0x93   : > { %385 = vmatprep.subr.mxu0 %v324_v56  ;;  %640 = vmatprep.subr.mxu1 %v324_v56 }
  0x94   : > { %386 = vmatpush2.msra.mxu0 %v323_v57  ;;  %672 = vmatpush2.msra.mxu1 %v323_v57 }
  0x95   : > { %387 = vmatprep.subr.mxu0 %v322_v58  ;;  %641 = vmatprep.subr.mxu1 %v322_v58 }
  0x96   : > { %388 = vmatpush2.msra.mxu0 %v321_v59  ;;  %673 = vmatpush2.msra.mxu1 %v321_v59 }
  0x97   : > { %389 = vmatprep.subr.mxu0 %v320_v60  ;;  %642 = vmatprep.subr.mxu1 %v320_v60 }
  0x98   : > { %390 = vmatpush2.msra.mxu0 %v319_v61  ;;  %674 = vmatpush2.msra.mxu1 %v319_v61 }
  0x99   : > { %391 = vmatprep.subr.mxu0 %v318_v62  ;;  %643 = vmatprep.subr.mxu1 %v318_v62 }
  0x9a   : > { %392 = vmatpush2.msra.mxu0 %v317_v63  ;;  %675 = vmatpush2.msra.mxu1 %v317_v63 }
  0x9b   : > { %393 = vmatprep.subr.mxu0 %v316_v0  ;;  %644 = vmatprep.subr.mxu1 %v316_v0 }
  0x9c   : > { %394 = vmatpush2.msra.mxu0 %v315_v1  ;;  %676 = vmatpush2.msra.mxu1 %v315_v1 }
  0x9d   : > { %395 = vmatprep.subr.mxu0 %v314_v2  ;;  %645 = vmatprep.subr.mxu1 %v314_v2 }
  0x9e   : > { %396 = vmatpush2.msra.mxu0 %v313_v3  ;;  %677 = vmatpush2.msra.mxu1 %v313_v3 }
  0x9f   : > { %397 = vmatprep.subr.mxu0 %v312_v4  ;;  %646 = vmatprep.subr.mxu1 %v312_v4 }
  0xa0   : > { %398 = vmatpush2.msra.mxu0 %v311_v5  ;;  %678 = vmatpush2.msra.mxu1 %v311_v5 }
  0xa1   : > { %399 = vmatprep.subr.mxu0 %v310_v6  ;;  %647 = vmatprep.subr.mxu1 %v310_v6 }
  0xa2   : > { %400 = vmatpush2.msra.mxu0 %v309_v7  ;;  %679 = vmatpush2.msra.mxu1 %v309_v7 }
  0xa3   : > { %401 = vmatprep.subr.mxu0 %v308_v8  ;;  %648 = vmatprep.subr.mxu1 %v308_v8 }
  0xa4   : > { %402 = vmatpush2.msra.mxu0 %v307_v9  ;;  %680 = vmatpush2.msra.mxu1 %v307_v9 }
  0xa5   : > { %403 = vmatprep.mubr.f32.mxu0 %v270_v10  ;;  %409 = vmatprep.mubr.f32.mxu1 %v272_v11 }
  0xa6   : > { %404 = vmatmul.mubr.f32.vlgmr.msra.gmra.mxu0 %v269_v12  ;;  %410 = vmatmul.mubr.f32.vlgmr.msra.gmra.mxu1 %v271_v13 }
  0xa7   : > { %415 = vmatprep.mubr.f32.mxu1 %v274_v14 }
  0xaa   : > { %416 = vmatmul.mubr.f32.gmra.mxu1 %v273_v15 }
 0x166   : > { %v405_v16 = vpop.f32.mrf.mxu0  ;;  %v411_v18 = vpop.f32.mrf.mxu1 }
 0x167   : > { %v422_v17 = vmul.f32 %v405_v16, %v405_v16  ;;  %v426_v23 = vrot.slane %v405_v16, 4 }
 0x168   : > { %v407_v19 = vpop.f32.mrf.mxu0  ;;  %v413_v27 = vpop.f32.mrf.mxu1 }
 0x169   : > { %v448_v20 = vrot.slane %v422_v17, 4  ;;  %v432_v21 = vsub.f32 %v411_v18, %v422_v17  ;;  %v423_v22 = vmul.f32 %v407_v19, %v407_v19  ;;  %v427_v30 = vrot.slane %v407_v19, 4 }
 0x16a   : > { %v417_v35 = vpop.f32.mrf.mxu1  ;;  %v430_v36 = vmul.f32 %v426_v23, %v405_v16 }
 0x16b   : > { %v452_v24 = vadd.f32 %v448_v20, %v422_v17  ;;  %v458_v25 = vrot.slane %v432_v21, 4  ;;  %v449_v26 = vrot.slane %v423_v22, 4  ;;  %v433_v28 = vsub.f32 %v413_v27, %v423_v22 }
 0x16c   : > { %v431_v39 = vmul.f32 %v427_v30, %v407_v19  ;;  %v434_v42 = vsub.f32 %v417_v35, %v430_v36  ;;  %v419_v43 = vpop.f32.mrf.mxu1  ;;  %v436_v47 = vmul.f32 2.0, %v430_v36 }
 0x16d   : > { %v462_v29 = vadd.f32 %v458_v25, %v432_v21  ;;  %v453_v31 = vadd.f32 %v449_v26, %v423_v22  ;;  %v459_v32 = vrot.slane %v433_v28, 4  ;;  %v454_v33 = vadd.f32 0.0001, %v452_v24 }
 0x16e   : > { %v435_v45 = vsub.f32 %v419_v43, %v431_v39  ;;  %v440_v46 = vmul.f32 2.0, %v434_v42  ;;  %v437_v50 = vmul.f32 2.0, %v431_v39  ;;  %v438_v51 = vadd.f32 0.0001, %v436_v47 }
 0x16f   : > { %v464_v34 = vadd.f32 0.0009, %v462_v29  ;;  %v463_v37 = vadd.f32 %v459_v32, %v433_v28  ;;  %v455_v40 = vadd.f32 0.0001, %v453_v31 }
 0x170   : > { %v441_v48 = vmul.f32 2.0, %v435_v45  ;;  %v442_v49 = vadd.f32 0.0009, %v440_v46  ;;  %v439_v55 = vadd.f32 0.0001, %v437_v50 }
 0x171   : > { %v466_v38 = vmul.f32 %v464_v34, %v454_v33  ;;  %v465_v41 = vadd.f32 0.0009, %v463_v37 }
 0x172   : > { %v443_v52 = vadd.f32 0.0009, %v441_v48  ;;  %v444_v53 = vmul.f32 %v442_v49, %v438_v51 }
 0x173   : > { %747 = vrcp.f32 %v466_v38  ;;  %v467_v44 = vmul.f32 %v465_v41, %v455_v40 }
 0x174   : > { %v445_v57 = vmul.f32 %v443_v52, %v439_v55 }
 0x175   : > { %749 = vrcp.f32 %v467_v44 }
 0x180   : > { %v748_v54 = vpop.eup %747 }
 0x181   : > { %v469_v56 = vmul.f32 %v748_v54, %v444_v53 }
 0x182   : > { %v750_v58 = vpop.eup %749 }
 0x183   : > { %v473_v59 = vsel %vm472_vm0, %v469_v56, 0.0  ;;  %v471_v60 = vmul.f32 %v750_v58, %v445_v57 }
 0x184   : > { %475 = vst [vmem:[%s238_s10] sm:$0xff] %v473_v59 }
 0x185   : > { %v474_v61 = vsel %vm472_vm0, %v471_v60, 0.0 }
 0x186   : > { %476 = vst [vmem:[%s238_s10 + $0x8] sm:$0xff] %v474_v61 }
 0x187   : > { %846 = shalt.err (!%p843_p9)
}
 0x188   : > { %s847_s30 = scalar_lea.hbm %s1102_s26, 256  ;;  %s851_s21 = scalar_lea.hbm %s1142_s3, 512 }
 0x189   : > { %p848_p1 = scmp.ne.s32.totalorder %s1102_s26, %s847_s30  ;;  %p852_p7 = scmp.lt.s32.totalorder %s1102_s26, %s1142_s3 }
 0x18a   : > { %p853_p11 = scmp.lt.s32.totalorder %s851_s21, %s847_s30 }
 0x18b   : > { %p849_p4 = pnand %p848_p1, %p1158_p12 }
 0x18c   : > { %p854_p8 = por %p853_p11, %p852_p7 }
 0x18d   : > { %p850_p6 = pneg %p849_p4 }
 0x18f   : > { %p855_p3 = pnand %p854_p8, %p850_p6 }
 0x191   : > { %858 = shalt.err (!%p855_p3)
}
 0x192   : > { %689 = dma.vmem_to_hbm [thread:$0]  (%p1158_p12), %s493_s7, 256, %s1102_s26, %s478_s9  }
 0x193 PF: > { %s504_s27 = sand.u32 1, %s893_s12   ;;  %p1159_p10 = scmp.ne.s32.totalorder %s1148_s19, 0 }
 0x194   : > { %p1160_p2 = scmp.ge.s32.totalorder %s905_s15, 2  ;;  %s505_s18 = scalar_lea.sflag [#allocation5], %s504_s27 }
 0x196   : > { %p703_p13 = pnand %p1160_p2, %p1159_p10 }
 0x198   : > { %p704_p0 = pneg %p703_p13 }
 0x19a   : > { %888 = dma.done.wait (%p704_p0), %s505_s18, 256  }
 0x19b   : > { %890 = vsyncadd (%p704_p0), %s505_s18, 4294967040  ;;  %p19_p5 = scmp.ge.s32.totalorder %s987_s24, 4   ;;  %s1161_s12 = smov %s897_s13 }
 0x19c   : > { %s1162_s13 = smov %s901_s14  ;;  %s1163_s14 = smov %s1004_s5 }
 0x19d   : > { %s1164_s15 = smov %s987_s24  ;;  %21 = sbr.rel (!%p19_p5) target bundleno = 7 (0x7), region = 94 }
 0x1a2   :  { %510 = vsyncpa [#allocation4], 1 }
 0x1a3   :  { %512 = vsyncpa [#allocation4 + $0x1], 1 }
 0x1a4   :  { %513 = vsyncpa [#allocation7], 1 }
 0x1a5   :  { %515 = vsyncpa [#allocation7 + $0x1], 1 }
 0x1a6   :  { %516 = vsyncpa [#allocation5], 1 }
 0x1a7   :  { %518 = vsyncpa [#allocation5 + $0x1], 1 }

</bundles_post_ra>
